<compile_context>
chip_gen: v5e
topology: v5e:2x2
jax: 0.10.0
libtpu: 0.0.40
codegen_flags: <defaults>
</compile_context>

<pallas_src>
import numpy as np

import jax
import jax.numpy as jnp
from jax.experimental import pallas as pl
from jax.experimental.pallas import tpu as pltpu


PACK = 8                    # 8x8 blocks packed per lane-dense row: 8 * 64 = 512 lanes
TILE_ROWS = 2048            # rows per grid block: 2048 * 512 * 4 B = 4 MiB per buffer
MIN_SPLIT_ROWS = 512        # only split into >= 2 grid steps above this many rows
VMEM_LIMIT_BYTES = 24 * 1024 * 1024


# ----------------------------------------------------------------------------
# Deterministic parameter construction (mirrors the PyTorch Utils.__init__)
# ----------------------------------------------------------------------------
def make_c_table():
    c = np.full((8, 8), 99.0, dtype=np.float32)
    c[:4, :4] = np.array([[17, 18, 24, 47],
                          [18, 21, 26, 66],
                          [24, 26, 56, 99],
                          [47, 66, 99, 99]], dtype=np.float32).T
    return c


_C_TABLE_FLAT64 = make_c_table().astype(np.float64).reshape(64)


def _recip_table(factor):
    """1 / (c_table * factor), flattened to 64 coefficients, float32."""
    if isinstance(factor, (int, float, np.integer, np.floating)):
        # Static factor: host-side float64 reciprocal for best pre-round accuracy.
        return jnp.asarray((1.0 / (_C_TABLE_FLAT64 * float(factor))).astype(np.float32))
    # Traced factor (e.g. differentiable compression strength): compute in JAX.
    return (1.0 / (jnp.asarray(_C_TABLE_FLAT64, jnp.float32) * factor)).astype(jnp.float32)


def _choose_tile(rows):
    """Largest 8-aligned tile <= TILE_ROWS, forcing >= 2 grid steps for larger
    inputs so the "parallel" axis can shard across v7x's two TensorCores."""
    if rows <= MIN_SPLIT_ROWS:
        return rows                      # single block == full dim (no (8,128) issue)
    half = -(-rows // 2)                 # ceil(rows / 2)
    half = -(-half // 8) * 8             # round up to a multiple of 8
    return min(TILE_ROWS, half)


# ----------------------------------------------------------------------------
# Pallas kernel: elementwise multiply by the (broadcast) reciprocal quantization
# row and apply the rounding function.  x/o blocks are (tile, PACK*64); the
# reciprocal row is (1, PACK*64) and resident in VMEM.
# ----------------------------------------------------------------------------
def _make_c_quantize_kernel(rounding):
    def kernel(x_ref, r_ref, o_ref):
        # Same math as the PyTorch forward: image * (1 / (c_table * factor)), round.
        o_ref[...] = rounding(x_ref[...] * r_ref[...])
    return kernel


def c_quantize(image, factor=1.0, rounding=jnp.round):
    """Pallas equivalent of the PyTorch c_quantize.forward."""
    orig_shape = image.shape
    assert orig_shape[-2:] == (8, 8), "expected trailing (8, 8) DCT blocks"

    x = image.astype(jnp.float32).reshape(-1, 64)   # one row per 8x8 block
    n = x.shape[0]
    recip64 = _recip_table(factor)                  # (64,) float32

    n_main = (n // PACK) * PACK                     # PACK-aligned prefix
    rows = n_main // PACK

    pieces = []
    if rows > 0:
        xm = x if n_main == n else x[:n_main]
        xm = xm.reshape(rows, PACK * 64)            # contiguous -> free reshape
        recip_row = jnp.tile(recip64, PACK).reshape(1, PACK * 64)

        tile = _choose_tile(rows)
        grid = (pl.cdiv(rows, tile),)

        out_main = pl.pallas_call(
            _make_c_quantize_kernel(rounding),
            out_shape=jax.ShapeDtypeStruct((rows, PACK * 64), jnp.float32),
            grid_spec=pltpu.PrefetchScalarGridSpec(
                num_scalar_prefetch=0,
                grid=grid,
                in_specs=[
                    pl.BlockSpec((tile, PACK * 64), lambda i: (i, 0)),
                    pl.BlockSpec((1, PACK * 64), lambda i: (0, 0)),  # resident recip
                ],
                out_specs=pl.BlockSpec((tile, PACK * 64), lambda i: (i, 0))),
            compiler_params=pltpu.CompilerParams(
                dimension_semantics=("parallel",),
                vmem_limit_bytes=VMEM_LIMIT_BYTES),
        )(xm, recip_row)
        pieces.append(out_main.reshape(n_main, 64))

    if n_main < n:
        # <= PACK-1 trailing blocks: negligible work, handled in plain JAX so the
        # kernel never needs a full-array pad pass or an output slice pass.
        tail = x[n_main:]
        pieces.append(rounding(tail * recip64.reshape(1, 64)))

    out = pieces[0] if len(pieces) == 1 else jnp.concatenate(pieces, axis=0)
    return out.reshape(orig_shape)


# ----------------------------------------------------------------------------
# Pure-JAX reference (direct transcription of the PyTorch forward)
# ----------------------------------------------------------------------------
def reference_c_quantize(image, factor=1.0, rounding=jnp.round):
    table = jnp.asarray(make_c_table())
    return rounding(image.astype(jnp.float32) / (table * factor))


def _check(out, image, factor, atol=1e-5):
    ref = np.asarray(reference_c_quantize(image, factor))
    o = np.asarray(out)
    diff = np.abs(o - ref)
    if np.all(diff <= atol):
        return
    # Only admissible discrepancy: the kernel multiplies by a precomputed
    # reciprocal, which can differ from true division by ~1 ulp and flip a
    # round-half-to-even decision at (near-)exact .5 quotients.
    q = np.asarray(image, np.float64) / (make_c_table().astype(np.float64) * float(factor))
    near_half = np.abs(np.abs(q - np.floor(q)) - 0.5) < 1e-4
    bad = diff > atol
    assert np.all(diff[bad] <= 1.0 + atol) and np.all(near_half[bad]), float(diff.max())


# ----------------------------------------------------------------------------
if __name__ == "__main__":
    key = jax.random.PRNGKey(0)
    k1, k2, k3 = jax.random.split(key, 3)

    # (batch=2, num_blocks=64, 8, 8): chroma DCT blocks; PACK-aligned main path.
    img1 = jax.random.normal(k1, (2, 64, 8, 8), jnp.float32) * 64.0
    out1 = jax.block_until_ready(c_quantize(img1, factor=1.0))
    assert out1.shape == img1.shape, out1.shape
    _check(out1, img1, 1.0)

    # Ragged block count + non-unit factor: kernel prefix + plain-JAX tail stitch.
    img2 = jax.random.normal(k2, (1, 67, 8, 8), jnp.float32) * 64.0
    out2 = jax.block_until_ready(c_quantize(img2, factor=2.0))
    assert out2.shape == img2.shape, out2.shape
    _check(out2, img2, 2.0)

    # Fewer blocks than PACK: pure plain-JAX tail path.
    img3 = jax.random.normal(k3, (1, 3, 8, 8), jnp.float32) * 64.0
    out3 = jax.block_until_ready(c_quantize(img3, factor=1.0))
    assert out3.shape == img3.shape, out3.shape
    _check(out3, img3, 1.0)

    print("KERNEL_OK")
</pallas_src>

<mosaic_0001>
module attributes {stable_mosaic.version = 11 : i64} {
  func.func @kernel(%arg0: i32, %arg1: memref<16x512xf32, #tpu.memory_space<vmem>>, %arg2: memref<1x512xf32, #tpu.memory_space<vmem>>, %arg3: memref<16x512xf32, #tpu.memory_space<vmem>>) attributes {dimension_semantics = [#tpu.dimension_semantics<parallel>], iteration_bounds = array<i64: 1>, scalar_prefetch = 0 : i64, scratch_operands = 0 : i64, tpu.core_type = #tpu.core_type<tc>, window_params = [{transform_indices = @transform_0, window_bounds = array<i64: 16, 512>}, {pipeline_mode = #tpu.pipeline_mode<synchronous>, transform_indices = @transform_1, window_bounds = array<i64: 1, 512>}, {transform_indices = @transform_2, window_bounds = array<i64: 16, 512>}]} {
    %c0 = arith.constant 0 : index
    %c0_0 = arith.constant 0 : index
    %0 = vector.load %arg1[%c0, %c0_0] : memref<16x512xf32, #tpu.memory_space<vmem>>, vector<16x512xf32>
    %c0_1 = arith.constant 0 : index
    %c0_2 = arith.constant 0 : index
    %1 = vector.load %arg2[%c0_1, %c0_2] : memref<1x512xf32, #tpu.memory_space<vmem>>, vector<1x512xf32>
    %2 = vector.broadcast %1 : vector<1x512xf32> to vector<16x512xf32>
    %3 = arith.mulf %0, %2 : vector<16x512xf32>
    %4 = math.roundeven %3 : vector<16x512xf32>
    %c0_3 = arith.constant 0 : index
    %c0_4 = arith.constant 0 : index
    %5 = vector.load %arg3[%c0_3, %c0_4] : memref<16x512xf32, #tpu.memory_space<vmem>>, vector<16x512xf32>
    tpu.vector_store %arg3[%c0_3, %c0_4], %4 {strides = array<i32>} : memref<16x512xf32, #tpu.memory_space<vmem>>, vector<16x512xf32>,
    return
  }
  func.func @transform_0(%arg0: i32) -> (i32, i32) {
    %c0_i32 = arith.constant 0 : i32
    %c0_i32_0 = arith.constant 0 : i32
    return %arg0, %c0_i32 : i32, i32
  }
  func.func @transform_1(%arg0: i32) -> (i32, i32) {
    %c0_i32 = arith.constant 0 : i32
    %c0_i32_0 = arith.constant 0 : i32
    %c0_i32_1 = arith.constant 0 : i32
    return %c0_i32, %c0_i32_0 : i32, i32
  }
  func.func @transform_2(%arg0: i32) -> (i32, i32) {
    %c0_i32 = arith.constant 0 : i32
    %c0_i32_0 = arith.constant 0 : i32
    return %arg0, %c0_i32 : i32, i32
  }
}

</mosaic_0001>

<bundles_post_ra>
// kernel: tpu_custom_call.1
= control target key start
LH: loop header
LB: loop body
LE: loop exit
PB: predicated region body
PF: predicated region fallthrough
CT: control target
= control target key end

     0   :  { %7 = vsyncpa [#allocation3], 0  ;;  %s334_s0 = inlined_call_operand.hbm [shape: f32[16,512], index: 0, kind: input, shape index: {}]   ;;  %s335_s1 = inlined_call_operand.hbm [shape: f32[1,512], index: 1, kind: input, shape index: {}]   ;;  %s336_s2 = inlined_call_operand.hbm [shape: f32[16,512], index: 2, kind: output, shape index: {}]  }
   0x1   :  { %8 = vsyncpa [#allocation6], 0 }
   0x2   :  { %9 = vsyncpa [#allocation4], 0  ;;  %s14_s11 = sshll.u32 %s334_s0, 4  ;;  %s251_s12 = smov [#allocation2]   ;;  %s15_s11 = int_to_ptr.hbm [resolvable:$true] %s14_s11 }
   0x3   :  { %s16_s13 = sshll.u32 %s251_s12, 4  ;;  %s28_s16 = sshll.u32 %s335_s1, 4  ;;  %s17_s13 = int_to_ptr.vmem [resolvable:$true] %s16_s13  ;;  %s29_s16 = int_to_ptr.hbm [resolvable:$true] %s28_s16 }
   0x4   :  { %s252_s17 = smov 512   ;;  %s253_s18 = smov 32  }
   0x5   :  { %22 = dma.hbm_to_vmem [thread:$0]  %s15_s11, 1024, %s17_s13, [#allocation3], %s252_s17, %s252_s17, %s253_s18  }
   0x6   :  { %s254_s19 = smov [#allocation5]  }
   0x7   :  { %s30_s20 = sshll.u32 %s254_s19, 4  ;;  %s31_s20 = int_to_ptr.vmem [resolvable:$true] %s30_s20 }
   0x8   :  { %33 = dma.hbm_to_vmem [thread:$0]  %s29_s16, 64, %s31_s20, [#allocation6]  }
   0x9   :  { %245 = dma.done.wait [#allocation3], 1024  }
   0xa   :  { %246 = vsyncadd [#allocation3], 4294966272 }
   0xb   :  { %247 = dma.done.wait [#allocation6], 64  }
   0xc   :  { %248 = vsyncadd [#allocation6], 4294967232  ;;  %v42_v0 = vld [vmem:[#allocation2] sm:$0xff]  ;;  %v43_v2 = vld [vmem:[#allocation2 + $0x8] sm:$0xff]  ;;  %s255_s0 = smov [#allocation7]   ;;  %s90_s23 = sshll.u32 %s336_s2, 4  ;;  %s91_s23 = int_to_ptr.hbm [resolvable:$true] %s90_s23 }
   0xd   :  { %v50_v1 = vld [vmem:[#allocation5] sm:$0xf]  ;;  %v44_v5 = vld [vmem:[#allocation2 + $0x10] sm:$0xff]  ;;  %v45_v7 = vld [vmem:[#allocation2 + $0x18] sm:$0xff]  ;;  %s88_s1 = sshll.u32 %s255_s0, 4  ;;  %s89_s1 = int_to_ptr.vmem [resolvable:$true] %s88_s1 }
   0xe   :  { %v52_v3 = vperm.slane %v50_v1, 0  ;;  %v53_v4 = vperm.slane %v50_v1, 1  ;;  %v54_v6 = vperm.slane %v50_v1, 2  ;;  %v55_v8 = vperm.slane %v50_v1, 3  ;;  %v46_v9 = vld [vmem:[#allocation2 + $0x20] sm:$0xff]  ;;  %v47_v10 = vld [vmem:[#allocation2 + $0x28] sm:$0xff] }
   0xf   :  { %v48_v11 = vld [vmem:[#allocation2 + $0x30] sm:$0xff]  ;;  %v49_v15 = vld [vmem:[#allocation2 + $0x38] sm:$0xff] }
  0x10   :  { %v60_v12 = vmul.f32 %v52_v3, %v42_v0  ;;  %v61_v13 = vmul.f32 %v53_v4, %v43_v2  ;;  %v62_v14 = vmul.f32 %v54_v6, %v44_v5  ;;  %v63_v16 = vmul.f32 %v55_v8, %v45_v7 }
  0x11   :  { %v64_v17 = vmul.f32 %v52_v3, %v46_v9  ;;  %v280_v18 = vmul.f32 %v53_v4, %v47_v10  ;;  %v282_v22 = vmul.f32 %v54_v6, %v48_v11  ;;  %v284_v26 = vmul.f32 %v55_v8, %v49_v15 }
  0x12   :  { %v104_v19 = vand.u32 2147483647, %v60_v12  ;;  %v106_v20 = vcvt.f32.s32 %v60_v12  ;;  %v112_v21 = vand.u32 2147483647, %v61_v13  ;;  %v114_v23 = vcvt.f32.s32 %v61_v13 }
  0x13   :  { %v120_v24 = vand.u32 2147483647, %v62_v14  ;;  %v122_v25 = vcvt.f32.s32 %v62_v14  ;;  %v109_v29 = vand.u32 2147483648, %v60_v12  ;;  %v117_v30 = vand.u32 2147483648, %v61_v13 }
  0x14   :  { %vm286_vm0 = vcmp.lt.f32.partialorder %v104_v19, 8388608.0  ;;  %v107_v28 = vcvt.s32.f32 %v106_v20  ;;  %v115_v31 = vcvt.s32.f32 %v114_v23  ;;  %v125_v33 = vand.u32 2147483648, %v62_v14 }
  0x15   :  { %v123_v32 = vcvt.s32.f32 %v122_v25  ;;  %v128_v34 = vand.u32 2147483647, %v63_v16  ;;  %vm290_vm1 = vcmp.lt.f32.partialorder %v112_v21, 8388608.0  ;;  %v130_v37 = vcvt.f32.s32 %v63_v16 }
  0x16   :  { %v108_v35 = vand.u32 2147483647, %v107_v28  ;;  %v136_v38 = vand.u32 2147483647, %v64_v17  ;;  %v116_v39 = vand.u32 2147483647, %v115_v31  ;;  %v138_v42 = vcvt.f32.s32 %v64_v17 }
  0x17   :  { %vm294_vm2 = vcmp.lt.f32.partialorder %v120_v24, 8388608.0  ;;  %v124_v41 = vand.u32 2147483647, %v123_v32  ;;  %vm298_vm3 = vcmp.lt.f32.partialorder %v128_v34, 8388608.0  ;;  %v131_v45 = vcvt.s32.f32 %v130_v37 }
  0x18   :  { %v110_v43 = vor.u32 %v109_v29, %v108_v35  ;;  %v133_v46 = vand.u32 2147483648, %v63_v16  ;;  %v118_v47 = vor.u32 %v117_v30, %v116_v39  ;;  %v139_v49 = vcvt.s32.f32 %v138_v42 }
  0x19   :  { %v126_v48 = vor.u32 %v125_v33, %v124_v41  ;;  %v141_v50 = vand.u32 2147483648, %v64_v17  ;;  %v132_v52 = vand.u32 2147483647, %v131_v45  ;;  %vm304_vm4 = vcmp.lt.f32.partialorder %v136_v38, 8388608.0 }
  0x1a   :  { %v111_v51 = vsel %vm286_vm0, %v110_v43, %v60_v12  ;;  %v146_v54 = vcvt.f32.s32 %v280_v18  ;;  %v119_v55 = vsel %vm290_vm1, %v118_v47, %v61_v13  ;;  %v140_v57 = vand.u32 2147483647, %v139_v49 }
  0x1b   :  { %76 = vst [vmem:[#allocation7] sm:$0xff] %v111_v51  ;;  %v127_v56 = vsel %vm294_vm2, %v126_v48, %v62_v14  ;;  %v144_v58 = vand.u32 2147483647, %v280_v18  ;;  %v134_v59 = vor.u32 %v133_v46, %v132_v52  ;;  %v149_v61 = vand.u32 2147483648, %v280_v18 }
  0x1c   :  { %77 = vst [vmem:[#allocation7 + $0x8] sm:$0xff] %v119_v55  ;;  %v147_v60 = vcvt.s32.f32 %v146_v54  ;;  %v154_v62 = vcvt.f32.s32 %v282_v22  ;;  %v142_v63 = vor.u32 %v141_v50, %v140_v57  ;;  %v152_v0 = vand.u32 2147483647, %v282_v22 }
  0x1d   :  { %78 = vst [vmem:[#allocation7 + $0x10] sm:$0xff] %v127_v56  ;;  %v157_v1 = vand.u32 2147483648, %v282_v22  ;;  %v162_v2 = vcvt.f32.s32 %v284_v26  ;;  %v135_v3 = vsel %vm298_vm3, %v134_v59, %v63_v16  ;;  %v160_v6 = vand.u32 2147483647, %v284_v26 }
  0x1e   :  { %v148_v4 = vand.u32 2147483647, %v147_v60  ;;  %v155_v5 = vcvt.s32.f32 %v154_v62  ;;  %79 = vst [vmem:[#allocation7 + $0x18] sm:$0xff] %v135_v3  ;;  %v143_v7 = vsel %vm304_vm4, %v142_v63, %v64_v17  ;;  %vm145_vm5 = vcmp.lt.f32.partialorder %v144_v58, 8388608.0 }
  0x1f   :  { %v163_v8 = vcvt.s32.f32 %v162_v2  ;;  %v165_v9 = vand.u32 2147483648, %v284_v26  ;;  %80 = vst [vmem:[#allocation7 + $0x20] sm:$0xff] %v143_v7  ;;  %vm153_vm6 = vcmp.lt.f32.partialorder %v152_v0, 8388608.0  ;;  %vm161_vm7 = vcmp.lt.f32.partialorder %v160_v6, 8388608.0 }
  0x20   :  { %v150_v10 = vor.u32 %v149_v61, %v148_v4  ;;  %v156_v11 = vand.u32 2147483647, %v155_v5 }
  0x21   :  { %v164_v12 = vand.u32 2147483647, %v163_v8 }
  0x22   :  { %v151_v13 = vsel %vm145_vm5, %v150_v10, %v280_v18  ;;  %v158_v14 = vor.u32 %v157_v1, %v156_v11 }
  0x23   :  { %81 = vst [vmem:[#allocation7 + $0x28] sm:$0xff] %v151_v13  ;;  %v166_v15 = vor.u32 %v165_v9, %v164_v12 }
  0x24   :  { %v159_v16 = vsel %vm153_vm6, %v158_v14, %v282_v22 }
  0x25   :  { %82 = vst [vmem:[#allocation7 + $0x30] sm:$0xff] %v159_v16  ;;  %v167_v17 = vsel %vm161_vm7, %v166_v15, %v284_v26 }
  0x26   :  { %83 = vst [vmem:[#allocation7 + $0x38] sm:$0xff] %v167_v17 }
  0x27   :  { %96 = dma.vmem_to_hbm [thread:$0]  %s89_s1, 1024, %s91_s23, [#allocation4], %s252_s17, %s252_s17, %s253_s18  }
  0x28   :  { %249 = dma.done.wait [#allocation4], 1024  }
  0x29   :  { %250 = vsyncadd [#allocation4], 4294966272 }
  0x2a   :  { %101 = vsyncpa [#allocation3], 1 }
  0x2b   :  { %102 = vsyncpa [#allocation6], 1 }
  0x2c   :  { %103 = vsyncpa [#allocation4], 1 }

</bundles_post_ra>
